<compile_context>
chip_gen: v5e
topology: v5e:2x2
jax: 0.10.0
libtpu: 0.0.40
codegen_flags: <defaults>
</compile_context>

<pallas_src>
import functools
import math

import jax
import jax.numpy as jnp
from jax.experimental import pallas as pl
from jax.experimental.pallas import tpu as pltpu


def make_positional_encoding(d_model: int, max_len: int = 10) -> jnp.ndarray:
    """Deterministic sinusoidal table, shape (max_len, d_model), float32."""
    # Same latent odd-d_model assumption as the PyTorch original; guard explicitly.
    assert d_model % 2 == 0, "d_model must be even for this sinusoidal table"
    position = jnp.arange(0, max_len, dtype=jnp.float32)[:, None]            # (L, 1)
    div_term = jnp.exp(
        jnp.arange(0, d_model, 2, dtype=jnp.float32) * (-math.log(10000.0) / d_model)
    )                                                                         # (D/2,)
    pe = jnp.zeros((max_len, d_model), dtype=jnp.float32)
    pe = pe.at[:, 0::2].set(jnp.sin(position * div_term))
    pe = pe.at[:, 1::2].set(jnp.cos(position * div_term))
    return pe


def _pe_add_kernel(x_ref, pe_ref, o_ref):
    # x_ref/o_ref: (bt, lt) lane-dense block; pe_ref: (1, lt) broadcasts over rows (VPU add).
    o_ref[...] = x_ref[...] + pe_ref[...]


def _round_up(a: int, m: int) -> int:
    return ((a + m - 1) // m) * m


def _vmem_capacity_bytes() -> int:
    """Physical VMEM bytes for this generation; conservative (v7x) fallback."""
    try:
        return int(pltpu.get_tpu_info().vmem_capacity_bytes)
    except Exception:
        return 64 * 1024 * 1024


def positional_encoding_forward(
    x: jnp.ndarray, pe: jnp.ndarray, *, force_pallas: bool = False
) -> jnp.ndarray:
    """x: (B, S, D); pe: (max_len, D). Returns x + pe[:S] broadcast over batch."""
    B, S, D = x.shape
    L = S * D
    itemsize = jnp.dtype(x.dtype).itemsize

    # Tiny inputs: a standalone pallas_call (fixed step overhead + HBM round trip) costs
    # more than letting XLA fuse the add into neighbors. The test forces the Pallas path.
    if not force_pallas and B * L * itemsize < (256 << 10):
        return x + pe[None, :S, :].astype(x.dtype)

    # Flatten trailing axes -> lane-dense layout; cast pe to the compute dtype.
    x_flat = x.reshape(B, L)
    pe_flat = pe[:S, :].astype(x.dtype).reshape(1, L)

    # Dtype-aware sublane multiple: f32 -> 8 rows, bf16 -> 16, int8/fp8 -> 32.
    sub = max(8, 32 // itemsize)

    # Generation-aware block budget: ~VMEM/16 so the live double-buffered footprint
    # (2x x-block + 2x out-block + pe row) stays ~VMEM/4.
    #   v5e/v6e (128 MiB) -> 8 MiB blocks, v7x (64 MiB) -> 4 MiB blocks.
    vmem_cap = _vmem_capacity_bytes()
    block_budget = max(1 << 20, min(8 << 20, vmem_cap // 16))

    # Lane tile: full L when a `sub`-row slab fits the budget, else a multiple of 128.
    if sub * L * itemsize <= block_budget:
        lt = L
    else:
        lt = max(128, (block_budget // (sub * itemsize)) // 128 * 128)
        if lt >= L:
            lt = L

    # Row tile: biggest multiple of `sub` rows that fits; must be a multiple of `sub`
    # or exactly B (full dim) to satisfy the min-tile constraint.
    rows_fit = max(1, block_budget // (lt * itemsize))
    if rows_fit >= B:
        bt = B
        # Whole problem fits one block: still split rows into several "parallel" blocks
        # (when B allows) so v7x's two TensorCores can both be used.
        if lt == L and B >= 2 * sub:
            target_blocks = min(8, B // sub)
            bt = min(B, _round_up(pl.cdiv(B, target_blocks), sub))
    else:
        bt = max(sub, (rows_fit // sub) * sub)
        if bt >= B:
            bt = B

    grid = (pl.cdiv(B, bt), pl.cdiv(L, lt))

    # Explicit scoped-VMEM limit: 4x block (double-buffered x + out) + headroom.
    # v7x: 32 MiB (== default, footprint ~16 MiB); v5e/v6e: 64 MiB (> v5e's 16 MiB default).
    vmem_limit = int(min(vmem_cap // 2, 64 << 20))

    cost = pl.CostEstimate(
        flops=B * L,
        transcendentals=0,
        bytes_accessed=2 * B * L * itemsize + L * itemsize,
    )

    out_flat = pl.pallas_call(
        _pe_add_kernel,
        out_shape=jax.ShapeDtypeStruct((B, L), x.dtype),
        grid_spec=pltpu.PrefetchScalarGridSpec(
            num_scalar_prefetch=0,
            grid=grid,
            in_specs=[
                # Lane-dense (bt, lt) block of x.
                pl.BlockSpec((bt, lt), lambda i, j: (i, j)),
                # Matching PE lane block; same for every row block (stays resident per j).
                pl.BlockSpec((1, lt), lambda i, j: (0, j)),
            ],
            out_specs=pl.BlockSpec((bt, lt), lambda i, j: (i, j)),
        ),
        compiler_params=pltpu.CompilerParams(
            dimension_semantics=("parallel", "parallel"),
            vmem_limit_bytes=vmem_limit,
        ),
        # Reuse x's HBM buffer for the output when the caller donates x.
        input_output_aliases={0: 0},
        cost_estimate=cost,
    )(x_flat, pe_flat)

    return out_flat.reshape(B, S, D)


if __name__ == "__main__":
    # Small shapes consistent with the module: batch=2, seq=8, d_model=32, max_len=10.
    B, S, D = 2, 8, 32
    MAX_LEN = 10

    key = jax.random.PRNGKey(0)
    x = jax.random.normal(key, (B, S, D), dtype=jnp.float32)

    pe = make_positional_encoding(D, max_len=MAX_LEN)

    # Force the Pallas path (the wrapper would otherwise short-circuit at this tiny size).
    fwd = jax.jit(functools.partial(positional_encoding_forward, force_pallas=True))
    out = jax.block_until_ready(fwd(x, pe))

    # Reference check in plain JAX (mirrors the PyTorch forward exactly).
    ref = x + pe[None, :S, :]
    assert out.shape == (B, S, D)
    assert jnp.allclose(out, ref, atol=1e-6, rtol=1e-6)

    print("KERNEL_OK")
</pallas_src>

<mosaic_0001>
module attributes {stable_mosaic.version = 11 : i64} {
  func.func @_pe_add_kernel(%arg0: i32, %arg1: i32, %arg2: memref<2x256xf32, #tpu.memory_space<vmem>>, %arg3: memref<1x256xf32, #tpu.memory_space<vmem>>, %arg4: memref<2x256xf32, #tpu.memory_space<vmem>>) attributes {dimension_semantics = [#tpu.dimension_semantics<parallel>, #tpu.dimension_semantics<parallel>], iteration_bounds = array<i64: 1, 1>, scalar_prefetch = 0 : i64, scratch_operands = 0 : i64, tpu.core_type = #tpu.core_type<tc>, window_params = [{transform_indices = @transform_0, window_bounds = array<i64: 2, 256>}, {transform_indices = @transform_1, window_bounds = array<i64: 1, 256>}, {transform_indices = @transform_2, window_bounds = array<i64: 2, 256>}]} {
    %c0 = arith.constant 0 : index
    %c0_0 = arith.constant 0 : index
    %0 = vector.load %arg2[%c0, %c0_0] : memref<2x256xf32, #tpu.memory_space<vmem>>, vector<2x256xf32>
    %c0_1 = arith.constant 0 : index
    %c0_2 = arith.constant 0 : index
    %1 = vector.load %arg3[%c0_1, %c0_2] : memref<1x256xf32, #tpu.memory_space<vmem>>, vector<1x256xf32>
    %2 = vector.broadcast %1 : vector<1x256xf32> to vector<2x256xf32>
    %3 = arith.addf %0, %2 : vector<2x256xf32>
    %c0_3 = arith.constant 0 : index
    %c0_4 = arith.constant 0 : index
    %4 = vector.load %arg4[%c0_3, %c0_4] : memref<2x256xf32, #tpu.memory_space<vmem>>, vector<2x256xf32>
    tpu.vector_store %arg4[%c0_3, %c0_4], %3 {strides = array<i32>} : memref<2x256xf32, #tpu.memory_space<vmem>>, vector<2x256xf32>,
    return
  }
  func.func @transform_0(%arg0: i32, %arg1: i32) -> (i32, i32) {
    %c0_i32 = arith.constant 0 : i32
    return %arg0, %arg1 : i32, i32
  }
  func.func @transform_1(%arg0: i32, %arg1: i32) -> (i32, i32) {
    %c0_i32 = arith.constant 0 : i32
    %c0_i32_0 = arith.constant 0 : i32
    return %c0_i32, %arg1 : i32, i32
  }
  func.func @transform_2(%arg0: i32, %arg1: i32) -> (i32, i32) {
    %c0_i32 = arith.constant 0 : i32
    return %arg0, %arg1 : i32, i32
  }
}

</mosaic_0001>

<bundles_post_ra>
// kernel: positional_encoding_forward.1
= control target key start
LH: loop header
LB: loop body
LE: loop exit
PB: predicated region body
PF: predicated region fallthrough
CT: control target
= control target key end

     0   :  { %vm17_vm0 = vcmask 1041408   ;;  %s50_s1 = inlined_call_operand.vmem [shape: f32[1,256], index: 1, kind: input, shape index: {}]   ;;  %s51_s0 = inlined_call_operand.vmem [shape: f32[2,256], index: 0, kind: input, shape index: {}, may-alias: {0,2}]   ;;  %s52_s2 = inlined_call_operand.vmem [shape: f32[2,256], index: 2, kind: output, shape index: {}, may-alias: {0,2}]  }
   0x1   :  { %v12_v0 = vld [vmem:[%s50_s1] sm:$0x3] }
   0x2   :  { %v14_v1 = vperm.slane %v12_v0, 0  ;;  %v15_v2 = vperm.slane %v12_v0, 1  ;;  %v11_v3 = vld [vmem:[%s51_s0] sm:$0xf] }
   0x4   :  { %v16_v4 = vrot.slane %v15_v2, 6 }
   0x6   :  { %v18_v5 = vsel %vm17_vm0, %v14_v1, %v16_v4 }
   0x7   :  { %v20_v6 = vadd.f32 %v18_v5, %v11_v3 }
   0x9   :  { %21 = vst [vmem:[%s52_s2] sm:$0xf] %v20_v6 }

</bundles_post_ra>
